<compile_context>
chip_gen: v7x
topology: tpu7x:2x2x1
jax: 0.10.0
libtpu: 0.0.40
codegen_flags: <defaults>
</compile_context>

<pallas_src>
import functools

import jax
import jax.numpy as jnp
from jax.experimental import pallas as pl
from jax.experimental.pallas import tpu as pltpu

_LANES = 128


def _round_up(x, m):
    return (x + m - 1) // m * m


def _pow(base, expo):
    # pow(x, p) = exp(p * log(x)).  Matches torch.pow on the domain used here:
    # base >= 0, and base == 0 only where the exponent is > 0 (result 0).
    return jnp.exp(expo * jnp.log(base))


def _awl_kernel(pred_ref, targ_ref, out_ref, *, omega, theta, epsilon, alpha):
    # pred_ref/targ_ref: (tm, 128) f32 tiles.  out_ref: (1, 1) f32 accumulator
    # (resident across the whole "arbitrary" grid axis).
    @pl.when(pl.program_id(0) == 0)
    def _init():
        out_ref[...] = jnp.zeros_like(out_ref)

    y = targ_ref[...].astype(jnp.float32)
    y_hat = pred_ref[...].astype(jnp.float32)

    delta = jnp.abs(y - y_hat)
    e = alpha - y

    # Branch 1: delta < theta
    loss1 = omega * jnp.log(1.0 + _pow(delta / omega, e))

    # Branch 2: delta >= theta
    t = theta / epsilon
    pow_t = _pow(jnp.float32(t), e)
    a_coef = omega * (1.0 / (1.0 + pow_t)) * e * _pow(jnp.float32(t), e - 1.0) * (1.0 / epsilon)
    c_const = theta * a_coef - omega * jnp.log(1.0 + pow_t)
    loss2 = a_coef * delta - c_const

    loss = jnp.where(delta < theta, loss1, loss2)
    out_ref[...] += jnp.sum(loss)


@functools.partial(
    jax.jit, static_argnames=("omega", "theta", "epsilon", "alpha")
)
def adaptive_wing_loss(pred, target, *, omega=14.0, theta=0.5, epsilon=1.0,
                       alpha=2.1):
    """Exact equivalent of AdaptiveWingLoss.forward (returns a f32 scalar)."""
    assert pred.shape == target.shape, (pred.shape, target.shape)
    total = pred.size

    pred_f = pred.reshape(-1).astype(jnp.float32)
    targ_f = target.reshape(-1).astype(jnp.float32)

    rows = pl.cdiv(total, _LANES)
    # Row tile: as large as practical (HBM-bound op; big tiles amortize the
    # per-grid-step overhead), clamped for tiny inputs.  1024x128 f32 tiles are
    # 512 KiB/input/buffer -> ~2 MiB double-buffered, far under VMEM on all chips.
    tm = min(1024, _round_up(rows, 8))
    rows_pad = _round_up(rows, tm)

    pad = rows_pad * _LANES - total
    if pad:
        # Zero padding contributes exactly 0 loss (delta = 0 < theta).
        pred_f = jnp.pad(pred_f, (0, pad))
        targ_f = jnp.pad(targ_f, (0, pad))

    pred2 = pred_f.reshape(rows_pad, _LANES)
    targ2 = targ_f.reshape(rows_pad, _LANES)

    kernel = functools.partial(
        _awl_kernel,
        omega=float(omega),
        theta=float(theta),
        epsilon=float(epsilon),
        alpha=float(alpha),
    )

    total_sum = pl.pallas_call(
        kernel,
        out_shape=jax.ShapeDtypeStruct((1, 1), jnp.float32),
        grid_spec=pltpu.PrefetchScalarGridSpec(
            num_scalar_prefetch=0,
            grid=(rows_pad // tm,),
            in_specs=[
                pl.BlockSpec((tm, _LANES), lambda i: (i, 0)),
                pl.BlockSpec((tm, _LANES), lambda i: (i, 0)),
            ],
            out_specs=pl.BlockSpec((1, 1), lambda i: (0, 0)),
        ),
        compiler_params=pltpu.CompilerParams(
            # Single reduction axis with a resident accumulator -> "arbitrary".
            dimension_semantics=("arbitrary",),
        ),
    )(pred2, targ2)

    # Denominator in the PyTorch code is len(loss1)+len(loss2) == total elements.
    return total_sum[0, 0] / jnp.float32(total)


def _awl_reference(pred, target, omega=14.0, theta=0.5, epsilon=1.0, alpha=2.1):
    """Plain-JAX reference mirroring the PyTorch module."""
    y = target.astype(jnp.float32)
    y_hat = pred.astype(jnp.float32)
    delta = jnp.abs(y - y_hat)
    e = alpha - y
    loss1 = omega * jnp.log(1.0 + _pow(delta / omega, e))
    t = theta / epsilon
    pow_t = _pow(jnp.float32(t), e)
    a_coef = omega * (1.0 / (1.0 + pow_t)) * e * _pow(jnp.float32(t), e - 1.0) * (1.0 / epsilon)
    c_const = theta * a_coef - omega * jnp.log(1.0 + pow_t)
    loss2 = a_coef * delta - c_const
    loss = jnp.where(delta < theta, loss1, loss2)
    return loss.mean()


if __name__ == "__main__":
    key = jax.random.PRNGKey(0)
    k1, k2, k3, k4 = jax.random.split(key, 4)

    # Small shapes consistent with the module's BxNxHxH heatmap inputs.
    B, N, H = 2, 4, 16
    target = jax.random.uniform(k1, (B, N, H, H), dtype=jnp.float32)
    pred = target + 0.3 * jax.random.normal(k2, (B, N, H, H), dtype=jnp.float32)

    out = jax.block_until_ready(adaptive_wing_loss(pred, target))
    ref = _awl_reference(pred, target)
    assert out.shape == (), out.shape
    assert jnp.allclose(out, ref, atol=1e-5, rtol=1e-5), (out, ref)

    # Non-128-aligned shape to exercise the zero-pad tail path.
    target2 = jax.random.uniform(k3, (2, 3, 15, 15), dtype=jnp.float32)
    pred2 = target2 + 0.3 * jax.random.normal(k4, (2, 3, 15, 15), dtype=jnp.float32)
    out2 = jax.block_until_ready(adaptive_wing_loss(pred2, target2))
    ref2 = _awl_reference(pred2, target2)
    assert jnp.allclose(out2, ref2, atol=1e-5, rtol=1e-5), (out2, ref2)

    print("KERNEL_OK")
</pallas_src>

<mosaic_0001>
module attributes {stable_mosaic.version = 11 : i64} {
  func.func @_awl_kernel(%arg0: i32, %arg1: memref<16x128xf32, #tpu.memory_space<vmem>>, %arg2: memref<16x128xf32, #tpu.memory_space<vmem>>, %arg3: memref<1x1xf32, #tpu.memory_space<vmem>>) attributes {dimension_semantics = [#tpu.dimension_semantics<arbitrary>], iteration_bounds = array<i64: 1>, scalar_prefetch = 0 : i64, scratch_operands = 0 : i64, tpu.core_type = #tpu.core_type<tc>, window_params = [{transform_indices = @transform_0, window_bounds = array<i64: 16, 128>}, {transform_indices = @transform_1, window_bounds = array<i64: 16, 128>}, {pipeline_mode = #tpu.pipeline_mode<synchronous>, transform_indices = @transform_2, window_bounds = array<i64: 1, 1>}]} {
    %c0_i32 = arith.constant 0 : i32
    %0 = arith.cmpi eq, %arg0, %c0_i32 : i32
    %1 = arith.extui %0 : i1 to i32
    %c0_i32_0 = arith.constant 0 : i32
    %2 = arith.cmpi ne, %1, %c0_i32_0 : i32
    scf.if %2 {
      %cst_23 = arith.constant 0.000000e+00 : f32
      %60 = vector.broadcast %cst_23 : f32 to vector<1x1xf32>
      %c0_24 = arith.constant 0 : index
      %c0_25 = arith.constant 0 : index
      %61 = vector.load %arg3[%c0_24, %c0_25] : memref<1x1xf32, #tpu.memory_space<vmem>>, vector<1x1xf32>
      tpu.vector_store %arg3[%c0_24, %c0_25], %60 {strides = array<i32>} : memref<1x1xf32, #tpu.memory_space<vmem>>, vector<1x1xf32>,
    } else {
    }
    %c0 = arith.constant 0 : index
    %c0_1 = arith.constant 0 : index
    %3 = vector.load %arg2[%c0, %c0_1] : memref<16x128xf32, #tpu.memory_space<vmem>>, vector<16x128xf32>
    %c0_2 = arith.constant 0 : index
    %c0_3 = arith.constant 0 : index
    %4 = vector.load %arg1[%c0_2, %c0_3] : memref<16x128xf32, #tpu.memory_space<vmem>>, vector<16x128xf32>
    %5 = arith.subf %3, %4 : vector<16x128xf32>
    %6 = math.absf %5 : vector<16x128xf32>
    %cst = arith.constant 2.100000e+00 : f32
    %7 = vector.broadcast %cst : f32 to vector<16x128xf32>
    %8 = arith.subf %7, %3 : vector<16x128xf32>
    %cst_4 = arith.constant 1.400000e+01 : f32
    %9 = vector.broadcast %cst_4 : f32 to vector<16x128xf32>
    %10 = arith.divf %6, %9 : vector<16x128xf32>
    %11 = math.log %10 : vector<16x128xf32>
    %12 = arith.mulf %8, %11 : vector<16x128xf32>
    %13 = math.exp %12 : vector<16x128xf32>
    %cst_5 = arith.constant 1.000000e+00 : f32
    %14 = vector.broadcast %cst_5 : f32 to vector<16x128xf32>
    %15 = arith.addf %14, %13 : vector<16x128xf32>
    %16 = math.log %15 : vector<16x128xf32>
    %cst_6 = arith.constant 1.400000e+01 : f32
    %17 = vector.broadcast %cst_6 : f32 to vector<16x128xf32>
    %18 = arith.mulf %17, %16 : vector<16x128xf32>
    %cst_7 = arith.constant 5.000000e-01 : f32
    %19 = math.log %cst_7 : f32
    %20 = vector.broadcast %19 : f32 to vector<16x128xf32>
    %21 = arith.mulf %8, %20 : vector<16x128xf32>
    %22 = math.exp %21 : vector<16x128xf32>
    %cst_8 = arith.constant 1.000000e+00 : f32
    %23 = vector.broadcast %cst_8 : f32 to vector<16x128xf32>
    %24 = arith.addf %23, %22 : vector<16x128xf32>
    %cst_9 = arith.constant 1.000000e+00 : f32
    %25 = vector.broadcast %cst_9 : f32 to vector<16x128xf32>
    %26 = arith.divf %25, %24 : vector<16x128xf32>
    %cst_10 = arith.constant 1.400000e+01 : f32
    %27 = vector.broadcast %cst_10 : f32 to vector<16x128xf32>
    %28 = arith.mulf %27, %26 : vector<16x128xf32>
    %29 = arith.mulf %28, %8 : vector<16x128xf32>
    %cst_11 = arith.constant 1.000000e+00 : f32
    %30 = vector.broadcast %cst_11 : f32 to vector<16x128xf32>
    %31 = arith.subf %8, %30 : vector<16x128xf32>
    %cst_12 = arith.constant 5.000000e-01 : f32
    %32 = math.log %cst_12 : f32
    %33 = vector.broadcast %32 : f32 to vector<16x128xf32>
    %34 = arith.mulf %31, %33 : vector<16x128xf32>
    %35 = math.exp %34 : vector<16x128xf32>
    %36 = arith.mulf %29, %35 : vector<16x128xf32>
    %cst_13 = arith.constant 1.000000e+00 : f32
    %37 = vector.broadcast %cst_13 : f32 to vector<16x128xf32>
    %38 = arith.mulf %36, %37 : vector<16x128xf32>
    %cst_14 = arith.constant 5.000000e-01 : f32
    %39 = vector.broadcast %cst_14 : f32 to vector<16x128xf32>
    %40 = arith.mulf %39, %38 : vector<16x128xf32>
    %cst_15 = arith.constant 1.000000e+00 : f32
    %41 = vector.broadcast %cst_15 : f32 to vector<16x128xf32>
    %42 = arith.addf %41, %22 : vector<16x128xf32>
    %43 = math.log %42 : vector<16x128xf32>
    %cst_16 = arith.constant 1.400000e+01 : f32
    %44 = vector.broadcast %cst_16 : f32 to vector<16x128xf32>
    %45 = arith.mulf %44, %43 : vector<16x128xf32>
    %46 = arith.subf %40, %45 : vector<16x128xf32>
    %47 = arith.mulf %38, %6 : vector<16x128xf32>
    %48 = arith.subf %47, %46 : vector<16x128xf32>
    %cst_17 = arith.constant 5.000000e-01 : f32
    %49 = vector.broadcast %cst_17 : f32 to vector<16x128xf32>
    %50 = arith.cmpf olt, %6, %49 : vector<16x128xf32>
    %51 = arith.select %50, %18, %48 : vector<16x128xi1>, vector<16x128xf32>
    %c0_18 = arith.constant 0 : index
    %c0_19 = arith.constant 0 : index
    %52 = vector.load %arg3[%c0_18, %c0_19] : memref<1x1xf32, #tpu.memory_space<vmem>>, vector<1x1xf32>
    %53 = vector.shape_cast %51 : vector<16x128xf32> to vector<1x16x128xf32>
    %cst_20 = arith.constant dense<0.000000e+00> : vector<1xf32>
    %54 = vector.multi_reduction <add>, %53, %cst_20 [1, 2] : vector<1x16x128xf32> to vector<1xf32>
    %55 = vector.shape_cast %54 : vector<1xf32> to vector<1x1x1xf32>
    %56 = vector.extract %55[0, 0, 0] : f32 from vector<1x1x1xf32>
    %57 = vector.broadcast %56 : f32 to vector<1x1xf32>
    %58 = arith.addf %52, %57 : vector<1x1xf32>
    %c0_21 = arith.constant 0 : index
    %c0_22 = arith.constant 0 : index
    %59 = vector.load %arg3[%c0_21, %c0_22] : memref<1x1xf32, #tpu.memory_space<vmem>>, vector<1x1xf32>
    tpu.vector_store %arg3[%c0_21, %c0_22], %58 {strides = array<i32>} : memref<1x1xf32, #tpu.memory_space<vmem>>, vector<1x1xf32>,
    return
  }
  func.func @transform_0(%arg0: i32) -> (i32, i32) {
    %c0_i32 = arith.constant 0 : i32
    %c0_i32_0 = arith.constant 0 : i32
    return %arg0, %c0_i32 : i32, i32
  }
  func.func @transform_1(%arg0: i32) -> (i32, i32) {
    %c0_i32 = arith.constant 0 : i32
    %c0_i32_0 = arith.constant 0 : i32
    return %arg0, %c0_i32 : i32, i32
  }
  func.func @transform_2(%arg0: i32) -> (i32, i32) {
    %c0_i32 = arith.constant 0 : i32
    %c0_i32_0 = arith.constant 0 : i32
    %c0_i32_1 = arith.constant 0 : i32
    return %c0_i32, %c0_i32_0 : i32, i32
  }
}

</mosaic_0001>

<bundles_post_ra>
// kernel: adaptive_wing_loss.1
= control target key start
LH: loop header
LB: loop body
LE: loop exit
PB: predicated region body
PF: predicated region fallthrough
CT: control target
= control target key end

     0   :  { %s233_s0 = inlined_call_operand.vmem [shape: f32[16,128], index: 0, kind: input, shape index: {}]   ;;  %s234_s1 = inlined_call_operand.vmem [shape: f32[16,128], index: 1, kind: input, shape index: {}]   ;;  %s235_s2 = inlined_call_operand.hbm [shape: f32[1,1], index: 2, kind: output, shape index: {}]  }
   0x1   :  { %v18_v0 = vld [vmem:[%s234_s1] sm:$0xff]  ;;  %v19_v1 = vld [vmem:[%s234_s1 + $0x8] sm:$0xff] }
   0x2   :  { %v20_v2 = vld [vmem:[%s233_s0] sm:$0xff]  ;;  %v21_v3 = vld [vmem:[%s233_s0 + $0x8] sm:$0xff]  ;;  %v26_v5 = vsub.f32 2.1, %v18_v0  ;;  %v27_v6 = vsub.f32 2.1, %v19_v1 }
   0x3   :  { %v22_v4 = vsub.f32 %v18_v0, %v20_v2  ;;  %v23_v7 = vsub.f32 %v19_v1, %v21_v3 }
   0x4   :  { %7 = vsyncpa [#allocation3], 0  ;;  %v49_v9 = vmul.f32 -0.6931472, %v26_v5  ;;  %v50_v10 = vmul.f32 -0.6931472, %v27_v6 }
   0x5   :  { %v209_v8 = vand.u32 2147483647, %v22_v4  ;;  %v211_v11 = vand.u32 2147483647, %v23_v7  ;;  %v122_v16 = vadd.f32 -1.0, %v26_v5  ;;  %v123_v17 = vadd.f32 -1.0, %v27_v6 }
   0x6   :  { %v51_v13 = vmul.f32 1.442695, %v49_v9  ;;  %v53_v15 = vmul.f32 1.442695, %v50_v10  ;;  %vm16_vm2 = vcmask 0   ;;  %v180_v7 = vmov 0.0  }
   0x7   :  { %v29_v12 = vmul.f32 0.071428575, %v209_v8  ;;  %v30_v14 = vmul.f32 0.071428575, %v211_v11  ;;  %v67_v18 = vmul.f32 -0.6931472, %v122_v16 }
   0x8   :  { %v68_v19 = vmul.f32 -0.6931472, %v123_v17  ;;  %vm89_vm0 = vcmp.lt.f32.partialorder %v209_v8, 0.5  ;;  %vm90_vm1 = vcmp.lt.f32.partialorder %v211_v11, 0.5  ;;  %17 = vst.msk [vmem:[#allocation2] sm:$0x1] %vm16_vm2, %v180_v7 }
   0x9   :  { %128 = vlog2.f32 %v29_v12  ;;  %v69_v20 = vmul.f32 1.442695, %v67_v18  ;;  %s181_s0 = smov [#allocation2]  }
   0xa   :  { %130 = vlog2.f32 %v30_v14  ;;  %v71_v22 = vmul.f32 1.442695, %v68_v19  ;;  %s114_s1 = sshll.u32 %s181_s0, 4  ;;  %s115_s1 = int_to_ptr.vmem [resolvable:$true] %s114_s1 }
   0xb   :  { %132 = vpow2.f32 %v51_v13  ;;  %s156_s18 = scalar_lea.vmem %s115_s1, 16  ;;  %s160_s19 = scalar_lea.vmem %s115_s1, 32 }
   0xc   :  { %134 = vpow2.f32 %v53_v15  ;;  %p157_p0 = scmp.ne.s32.totalorder %s115_s1, %s156_s18  ;;  %p161_p1 = scmp.lt.s32.totalorder %s115_s1, %s115_s1 }
   0xd   :  { %136 = vpow2.f32 %v69_v20  ;;  %p162_p2 = scmp.lt.s32.totalorder %s160_s19, %s156_s18 }
   0xe   :  { %138 = vpow2.f32 %v71_v22 }
   0xf   :  { %p163_p3 = por %p162_p2, %p161_p1 }
  0x11   :  { %p164_p4 = pnand %p163_p3, %p157_p0 }
  0x13   :  { %v129_v21 = vpop.eup %128 }
  0x14   :  { %v131_v23 = vpop.eup %130  ;;  %v32_v24 = vmul.f32 0.6931472, %v129_v21 }
  0x15   :  { %v133_v25 = vpop.eup %132  ;;  %v34_v26 = vmul.f32 0.6931472, %v131_v23 }
  0x16   :  { %v135_v27 = vpop.eup %134  ;;  %v35_v28 = vmul.f32 %v32_v24, %v26_v5  ;;  %v55_v29 = vadd.f32 1.0, %v133_v25 }
  0x17   :  { %v36_v30 = vmul.f32 %v34_v26, %v27_v6  ;;  %v56_v31 = vadd.f32 1.0, %v135_v27  ;;  %v137_v34 = vpop.eup %136 }
  0x18   :  { %v37_v32 = vmul.f32 1.442695, %v35_v28  ;;  %140 = vrcp.f32 %v55_v29  ;;  %v139_v35 = vpop.eup %138 }
  0x19   :  { %v39_v33 = vmul.f32 1.442695, %v36_v30  ;;  %142 = vrcp.f32 %v56_v31 }
  0x1a   :  { %144 = vpow2.f32 %v37_v32 }
  0x1b   :  { %146 = vpow2.f32 %v39_v33 }
  0x1c   :  { %148 = vlog2.f32 %v55_v29 }
  0x1d   :  { %150 = vlog2.f32 %v56_v31 }
  0x22   :  { %v141_v36 = vpop.eup %140 }
  0x23   :  { %v143_v37 = vpop.eup %142  ;;  %v61_v38 = vmul.f32 14.0, %v141_v36 }
  0x24   :  { %v145_v39 = vpop.eup %144  ;;  %v62_v40 = vmul.f32 14.0, %v143_v37 }
  0x25   :  { %v147_v41 = vpop.eup %146  ;;  %v41_v42 = vadd.f32 1.0, %v145_v39  ;;  %v63_v43 = vmul.f32 %v61_v38, %v26_v5 }
  0x26   :  { %v149_v44 = vpop.eup %148  ;;  %v42_v45 = vadd.f32 1.0, %v147_v41  ;;  %v64_v46 = vmul.f32 %v62_v40, %v27_v6 }
  0x27   :  { %v151_v47 = vpop.eup %150  ;;  %152 = vlog2.f32 %v41_v42  ;;  %v73_v48 = vmul.f32 %v137_v34, %v63_v43  ;;  %v78_v49 = vmul.f32 0.6931472, %v149_v44 }
  0x28   :  { %154 = vlog2.f32 %v42_v45  ;;  %v74_v50 = vmul.f32 %v139_v35, %v64_v46  ;;  %v80_v51 = vmul.f32 0.6931472, %v151_v47 }
  0x29   :  { %v75_v52 = vmul.f32 0.5, %v73_v48  ;;  %v81_v53 = vmul.f32 14.0, %v78_v49  ;;  %v85_v57 = vmul.f32 %v73_v48, %v209_v8  ;;  %v93_v8 = vld [vmem:[#allocation2] sm:$0x1] }
  0x2a   :  { %v76_v54 = vmul.f32 0.5, %v74_v50  ;;  %v82_v55 = vmul.f32 14.0, %v80_v51  ;;  %v86_v59 = vmul.f32 %v74_v50, %v211_v11 }
  0x2b   :  { %v83_v56 = vsub.f32 %v75_v52, %v81_v53 }
  0x2c   :  { %v84_v58 = vsub.f32 %v76_v54, %v82_v55 }
  0x2d   :  { %v87_v63 = vsub.f32 %v85_v57, %v83_v56 }
  0x2e   :  { %v88_v1 = vsub.f32 %v86_v59, %v84_v58 }
  0x31   :  { %v153_v60 = vpop.eup %152 }
  0x32   :  { %v155_v61 = vpop.eup %154  ;;  %v44_v62 = vmul.f32 0.6931472, %v153_v60 }
  0x33   :  { %v46_v0 = vmul.f32 0.6931472, %v155_v61 }
  0x34   :  { %v47_v2 = vmul.f32 14.0, %v44_v62 }
  0x35   :  { %v48_v3 = vmul.f32 14.0, %v46_v0 }
  0x36   :  { %v91_v4 = vsel %vm89_vm0, %v47_v2, %v87_v63 }
  0x37   :  { %v92_v5 = vsel %vm90_vm1, %v48_v3, %v88_v1 }
  0x38   :  { %v94_v6 = vadd.f32 %v92_v5, %v91_v4 }
  0x3a   :  { %95 = vadd.xlane.f32.xlu0 %v94_v6 }
  0xc7   :  { %v96_v9 = vpop.xlane.xlu0 %95 }
  0xc8   :  { %v97_v10 = vrot.slane %v96_v9, 4 }
  0xca   :  { %v98_v12 = vadd.f32 %v97_v10, %v96_v9 }
  0xcc   :  { %v99_v13 = vrot.slane %v98_v12, 2 }
  0xce   :  { %v100_v14 = vadd.f32 %v99_v13, %v98_v12 }
  0xd0   :  { %v101_v15 = vrot.slane %v100_v14, 1 }
  0xd2   :  { %v102_v16 = vadd.f32 %v101_v15, %v100_v14 }
  0xd4   :  { %124 = vpush %v102_v16 }
 0x105   :  { %s125_s17 = spop %124 }
 0x106   :  { %v104_v11 = vstv %s125_s17 }
 0x107   :  { %v105_v17 = vadd.f32 %v104_v11, %v93_v8 }
 0x109   :  { %107 = vst.msk [vmem:[#allocation2] sm:$0x1] %vm16_vm2, %v105_v17 }
 0x10a   :  { %167 = shalt.err (!%p164_p4)
}
 0x10b   :  { %s168_s22 = scalar_lea.hbm %s235_s2, 16 }
 0x10c   :  { %p169_p5 = scmp.ne.s32.totalorder %s235_s2, %s168_s22  ;;  %p172_p6 = scmp.lt.u32.totalorder %s168_s22, %s235_s2 }
 0x10e   :  { %p174_p7 = pnand %p172_p6, %p169_p5 }
 0x110   :  { %177 = shalt.err (!%p174_p7)
}
 0x111   :  { %117 = dma.vmem_to_hbm [thread:$0]  %s115_s1, 16, %s235_s2, [#allocation3]  }
 0x112   :  { %178 = dma.done.wait [#allocation3], 16  }
 0x113   :  { %179 = vsyncadd [#allocation3], 4294967280 }
 0x114   :  { %121 = vsyncpa [#allocation3], 1 }

</bundles_post_ra>
